<compile_context>
chip_gen: v7x
topology: tpu7x:2x2x1
jax: 0.10.0
libtpu: 0.0.40
codegen_flags: <defaults>
</compile_context>

<pallas_src>
import jax
import jax.numpy as jnp
from jax.experimental import pallas as pl
from jax.experimental.pallas import tpu as pltpu

KH = KW = 3  # conv kernel size from the module


def _conv2x_relu_kernel(p_ref, w_ref, b2_ref, o_ref):
    """Single grid step: o = relu(2 * (W @ P) + 2*b).

    p_ref : (K, N*M)     im2col patches, K = Cin*KH*KW, M = Ho*Wo (lane-dense)
    w_ref : (Cout, K)    fused conv weights (OIHW flattened over I, KH, KW)
    b2_ref: (Cout, 1)    2 * bias (pre-doubled in the wrapper)
    o_ref : (Cout, N*M)  lane-dense output
    """
    # One batched MXU matmul for the whole batch (replaces the per-image loop).
    acc = jnp.dot(w_ref[...], p_ref[...], preferred_element_type=jnp.float32)
    # relu(2*(conv + b)) == max(2*acc + 2*b, 0); (Cout,1) bias broadcasts once.
    o_ref[...] = jnp.maximum(acc + acc + b2_ref[...], 0.0).astype(o_ref.dtype)


def mixed_precision_weights_net(x_nchw, weight_oihw, bias):
    """Forward pass of MixedPrecisionWeightsTestNet.

    x_nchw:      (N, Cin, H, W)      float32
    weight_oihw: (Cout, Cin, KH, KW) float32  (PyTorch Conv2d layout)
    bias:        (Cout,)             float32
    returns      (N, Cout, H-2, W-2) float32
    """
    n, c_in, h, w = x_nchw.shape
    c_out = weight_oihw.shape[0]
    h_out, w_out = h - KH + 1, w - KW + 1
    k_dim = c_in * KH * KW
    m_dim = h_out * w_out
    nm = n * m_dim

    # im2col -> (K, N*M).  Row ordering (c-major, then kh, kw) matches
    # weight.reshape(Cout, Cin*KH*KW); column ordering (n-major, m-minor)
    # matches the output reshape below.  XLA fuses this producer into the
    # pallas input DMA (allow_input_fusion), so it is not an HBM round-trip.
    taps = [x_nchw[:, :, kh:kh + h_out, kw:kw + w_out]        # (N, Cin, Ho, Wo)
            for kh in range(KH) for kw in range(KW)]
    patches = (jnp.stack(taps, axis=2)                         # (N, Cin, 9, Ho, Wo)
               .reshape(n, k_dim, m_dim)                       # (N, K, M)
               .transpose(1, 0, 2)                             # (K, N, M)
               .reshape(k_dim, nm))                            # (K, N*M)

    w_fused = weight_oihw.reshape(c_out, k_dim)                # (Cout, K) = (3, 36)
    b2 = (2.0 * bias).reshape(c_out, 1)                        # pre-doubled bias

    out = pl.pallas_call(
        _conv2x_relu_kernel,
        out_shape=jax.ShapeDtypeStruct((c_out, nm), jnp.float32),
        grid=(1,),                                             # one step, all in VMEM
        in_specs=[
            pl.BlockSpec((k_dim, nm), lambda i: (0, 0)),       # ~56 KB
            pl.BlockSpec((c_out, k_dim), lambda i: (0, 0)),
            pl.BlockSpec((c_out, 1), lambda i: (0, 0)),
        ],
        out_specs=pl.BlockSpec((c_out, nm), lambda i: (0, 0)),
        compiler_params=pltpu.CompilerParams(
            dimension_semantics=("arbitrary",),
            # Fuse the im2col producer into the pallas input DMA so `patches`
            # is never materialized in HBM.
            allow_input_fusion=[True, False, False],
        ),
    )(patches, w_fused, b2)

    # (Cout, N*M) -> (Cout, N, Ho, Wo) -> NCHW.  Tiny (4.7 KB) wrapper transpose.
    return out.reshape(c_out, n, h_out, w_out).transpose(1, 0, 2, 3)


def _reference(x_nchw, weight_oihw, bias):
    """Pure-JAX reference (matches torch.nn.Conv2d + add + relu)."""
    conv = jax.lax.conv_general_dilated(
        x_nchw, weight_oihw, window_strides=(1, 1), padding="VALID",
        dimension_numbers=("NCHW", "OIHW", "NCHW"),
        precision=jax.lax.Precision.HIGHEST)
    conv = conv + bias.reshape(1, -1, 1, 1)
    return jnp.maximum(conv + conv, 0.0)


if __name__ == "__main__":
    # Small shapes consistent with the module: batch=2, in_channels=4, 16x16.
    N, C_IN, H, W = 2, 4, 16, 16
    C_OUT = 3

    key = jax.random.PRNGKey(0)
    kx, kw, kb = jax.random.split(key, 3)

    x = jax.random.normal(kx, (N, C_IN, H, W), dtype=jnp.float32)
    fan_in = C_IN * KH * KW
    bound = 1.0 / (fan_in ** 0.5)
    weight = jax.random.uniform(kw, (C_OUT, C_IN, KH, KW),
                                minval=-bound, maxval=bound, dtype=jnp.float32)
    bias = jax.random.uniform(kb, (C_OUT,),
                              minval=-bound, maxval=bound, dtype=jnp.float32)

    out = mixed_precision_weights_net(x, weight, bias)
    out = jax.block_until_ready(out)

    ref = jax.block_until_ready(_reference(x, weight, bias))
    assert out.shape == (N, C_OUT, H - 2, W - 2), out.shape
    # Tolerance accommodates MXU multi-pass f32 accumulation differences between
    # the Pallas matmul and the XLA conv; any structural error (tap ordering,
    # bias, scaling) would produce O(0.1 - 1.0) discrepancies.
    assert jnp.allclose(out, ref, atol=5e-3, rtol=5e-3), \
        float(jnp.max(jnp.abs(out - ref)))

    print("KERNEL_OK")
</pallas_src>

<mosaic_0001>
module attributes {stable_mosaic.version = 11 : i64} {
  func.func @_conv2x_relu_kernel(%arg0: i32, %arg1: memref<36x392xf32, #tpu.memory_space<vmem>>, %arg2: memref<3x36xf32, #tpu.memory_space<vmem>>, %arg3: memref<3x1xf32, #tpu.memory_space<vmem>>, %arg4: memref<3x392xf32, #tpu.memory_space<vmem>>) attributes {dimension_semantics = [#tpu.dimension_semantics<arbitrary>], iteration_bounds = array<i64: 1>, scalar_prefetch = 0 : i64, scratch_operands = 0 : i64, tpu.core_type = #tpu.core_type<tc>, window_params = [{pipeline_mode = #tpu.pipeline_mode<synchronous>, transform_indices = @transform_0, window_bounds = array<i64: 36, 392>}, {pipeline_mode = #tpu.pipeline_mode<synchronous>, transform_indices = @transform_1, window_bounds = array<i64: 3, 36>}, {pipeline_mode = #tpu.pipeline_mode<synchronous>, transform_indices = @transform_2, window_bounds = array<i64: 3, 1>}, {pipeline_mode = #tpu.pipeline_mode<synchronous>, transform_indices = @transform_3, window_bounds = array<i64: 3, 392>}]} {
    %c0 = arith.constant 0 : index
    %c0_0 = arith.constant 0 : index
    %0 = vector.load %arg2[%c0, %c0_0] : memref<3x36xf32, #tpu.memory_space<vmem>>, vector<3x36xf32>
    %c0_1 = arith.constant 0 : index
    %c0_2 = arith.constant 0 : index
    %1 = vector.load %arg1[%c0_1, %c0_2] : memref<36x392xf32, #tpu.memory_space<vmem>>, vector<36x392xf32>
    %cst = arith.constant dense<0.000000e+00> : vector<3x392xf32>
    %2 = tpu.matmul %0, %1, %cst {dimension_numbers = #tpu.dot_dimension_numbers<[1], [0], [0], [1], [0, 0, 1, 1], [], []>} : vector<3x36xf32>, vector<36x392xf32>, vector<3x392xf32> -> vector<3x392xf32>
    %3 = arith.addf %2, %2 : vector<3x392xf32>
    %c0_3 = arith.constant 0 : index
    %c0_4 = arith.constant 0 : index
    %4 = vector.load %arg3[%c0_3, %c0_4] : memref<3x1xf32, #tpu.memory_space<vmem>>, vector<3x1xf32>
    %5 = vector.broadcast %4 : vector<3x1xf32> to vector<3x392xf32>
    %6 = arith.addf %3, %5 : vector<3x392xf32>
    %cst_5 = arith.constant 0.000000e+00 : f32
    %7 = vector.broadcast %cst_5 : f32 to vector<3x392xf32>
    %8 = arith.maximumf %6, %7 : vector<3x392xf32>
    %c0_6 = arith.constant 0 : index
    %c0_7 = arith.constant 0 : index
    %9 = vector.load %arg4[%c0_6, %c0_7] : memref<3x392xf32, #tpu.memory_space<vmem>>, vector<3x392xf32>
    tpu.vector_store %arg4[%c0_6, %c0_7], %8 {strides = array<i32>} : memref<3x392xf32, #tpu.memory_space<vmem>>, vector<3x392xf32>,
    return
  }
  func.func @transform_0(%arg0: i32) -> (i32, i32) {
    %c0_i32 = arith.constant 0 : i32
    %c0_i32_0 = arith.constant 0 : i32
    %c0_i32_1 = arith.constant 0 : i32
    return %c0_i32, %c0_i32_0 : i32, i32
  }
  func.func @transform_1(%arg0: i32) -> (i32, i32) {
    %c0_i32 = arith.constant 0 : i32
    %c0_i32_0 = arith.constant 0 : i32
    %c0_i32_1 = arith.constant 0 : i32
    return %c0_i32, %c0_i32_0 : i32, i32
  }
  func.func @transform_2(%arg0: i32) -> (i32, i32) {
    %c0_i32 = arith.constant 0 : i32
    %c0_i32_0 = arith.constant 0 : i32
    %c0_i32_1 = arith.constant 0 : i32
    return %c0_i32, %c0_i32_0 : i32, i32
  }
  func.func @transform_3(%arg0: i32) -> (i32, i32) {
    %c0_i32 = arith.constant 0 : i32
    %c0_i32_0 = arith.constant 0 : i32
    %c0_i32_1 = arith.constant 0 : i32
    return %c0_i32, %c0_i32_0 : i32, i32
  }
}

</mosaic_0001>

<bundles_post_ra>
// kernel: tpu_custom_call.1
= control target key start
LH: loop header
LB: loop body
LE: loop exit
PB: predicated region body
PF: predicated region fallthrough
CT: control target
= control target key end

     0   :  { %8 = vsyncpa [#allocation3], 0  ;;  %s388_s0 = inlined_call_operand.hbm [shape: f32[36,392], index: 0, kind: input, shape index: {}]   ;;  %s389_s1 = inlined_call_operand.vmem [shape: f32[3,36], index: 1, kind: input, shape index: {}]   ;;  %s390_s2 = inlined_call_operand.vmem [shape: f32[3,1], index: 2, kind: input, shape index: {}]   ;;  %s391_s3 = inlined_call_operand.hbm [shape: f32[3,392], index: 3, kind: output, shape index: {}]  }
   0x1   :  { %9 = vsyncpa [#allocation4], 0  ;;  %s332_s12 = smov [#allocation2]   ;;  %s284_s16 = scalar_lea.hbm %s388_s0, 2560 }
   0x2   :  { %s15_s13 = sshll.u32 %s332_s12, 4  ;;  %p285_p0 = scmp.ne.s32.totalorder %s388_s0, %s284_s16  ;;  %s16_s13 = int_to_ptr.vmem [resolvable:$true] %s15_s13 }
   0x3   :  { %p288_p1 = scmp.lt.u32.totalorder %s284_s16, %s388_s0 }
   0x5   :  { %p290_p2 = pnand %p288_p1, %p285_p0 }
   0x7   :  { %293 = shalt.err (!%p290_p2)
}
   0x8   :  { %s294_s21 = scalar_lea.vmem %s16_s13, 2560  ;;  %p299_p4 = scmp.lt.s32.totalorder %s16_s13, %s16_s13 }
   0x9   :  { %p295_p3 = scmp.ne.s32.totalorder %s16_s13, %s294_s21  ;;  %p300_p5 = scmp.lt.s32.totalorder %s294_s21, %s294_s21 }
   0xb   :  { %p301_p6 = por %p300_p5, %p299_p4 }
   0xd   :  { %p302_p7 = pnand %p301_p6, %p295_p3 }
   0xf   :  { %305 = shalt.err (!%p302_p7)
}
  0x10   :  { %s333_s22 = smov 512   ;;  %s334_s23 = smov 32  }
  0x11   :  { %21 = dma.hbm_to_vmem [thread:$0]  %s388_s0, 2560, %s16_s13, [#allocation3], %s333_s22, %s333_s22, %s334_s23  }
  0x12   :  { %328 = dma.done.wait [#allocation3], 2560  }
  0x13   :  { %329 = vsyncadd [#allocation3], 4294964736  ;;  %v335_v0 = vmov 0.0   ;;  %v336_v1 = vmov 0   ;;  %v31_v2 = vld [vmem:[#allocation2 + $0x8] sm:$0xff]  ;;  %v33_v4 = vld [vmem:[#allocation2 + $0x18] sm:$0xff] }
  0x14   :  { %131 = vmatprep.mubr.f32.mxu0 %v335_v0  ;;  %202 = vmatprep.mubr.f32.mxu1 %v335_v0  ;;  %v35_v3 = vld [vmem:[#allocation2 + $0x28] sm:$0xff]  ;;  %v37_v6 = vld [vmem:[#allocation2 + $0x38] sm:$0xff]  ;;  %v30_v7 = vld [vmem:[#allocation2] sm:$0xff]  ;;  %vm54_vm0 = vcmask 1043456   ;;  %vm50_vm1 = vcmask 293888   ;;  %vm236_vm2 = vcmask 1042432  }
  0x15   :  { %283 = vset.pattern.permute.xlu0 %v336_v1  ;;  %v261_v5 = vpack.c.bf16 %v35_v3, %v31_v2  ;;  %v34_v8 = vld [vmem:[#allocation2 + $0x20] sm:$0xff]  ;;  %v269_v9 = vpack.c.bf16 %v37_v6, %v33_v4  ;;  %v32_v11 = vld [vmem:[#allocation2 + $0x10] sm:$0xff]  ;;  %v39_v13 = vld [vmem:[#allocation2 + $0x48] sm:$0xff]  ;;  %vm237_vm3 = vcmask 63492  }
  0x16   :  { %v263_v10 = vpack.c.bf16 %v34_v8, %v30_v7  ;;  %v36_v12 = vld [vmem:[#allocation2 + $0x30] sm:$0xff]  ;;  %v43_v15 = vld [vmem:[#allocation2 + $0x68] sm:$0xff]  ;;  %v41_v16 = vld [vmem:[#allocation2 + $0x58] sm:$0xff] }
  0x17   :  { %262 = vmatprep.subr.bf16.mxu0 %v261_v5  ;;  %v271_v14 = vpack.c.bf16 %v36_v12, %v32_v11  ;;  %v45_v17 = vld [vmem:[#allocation2 + $0x78] sm:$0xff]  ;;  %270 = vmatprep.subr.bf16.mxu1 %v269_v9  ;;  %v265_v18 = vpack.c.bf16 %v43_v15, %v39_v13  ;;  %v38_v20 = vld [vmem:[#allocation2 + $0x40] sm:$0xff]  ;;  %v40_v22 = vld [vmem:[#allocation2 + $0x50] sm:$0xff] }
  0x18   :  { %264 = vmatpush1.bf16.msra.mxu0 %v263_v10  ;;  %v273_v19 = vpack.c.bf16 %v45_v17, %v41_v16  ;;  %v42_v21 = vld [vmem:[#allocation2 + $0x60] sm:$0xff]  ;;  %v44_v24 = vld [vmem:[#allocation2 + $0x70] sm:$0xff]  ;;  %v47_v26 = vld [vmem:[#allocation2 + $0x88] sm:$0xf] }
  0x19   :  { %272 = vmatpush1.bf16.msra.mxu1 %v271_v14  ;;  %v267_v23 = vpack.c.bf16 %v42_v21, %v38_v20  ;;  %266 = vmatprep.subr.bf16.mxu0 %v265_v18  ;;  %v275_v25 = vpack.c.bf16 %v44_v24, %v40_v22  ;;  %v49_v27 = vld [vmem:[#allocation2 + $0x98] sm:$0xf]  ;;  %v213_v28 = vld [vmem:[%s390_s2] sm:$0x7]  ;;  %v48_v30 = vld [vmem:[#allocation2 + $0x90] sm:$0xf] }
  0x1a   :  { %274 = vmatprep.subr.bf16.mxu1 %v273_v19  ;;  %216 = vperm.xlu0 %283, %v213_v28   ;;  %v46_v29 = vld [vmem:[#allocation2 + $0x80] sm:$0xf]  ;;  %vm238_vm4 = vmor %vm237_vm3, %vm236_vm2 }
  0x1b   :  { %v29_v31 = vld [vmem:[%s389_s1] sm:$0x7]  ;;  %s337_s1 = smov [#allocation5]  }
  0x1c   :  { %268 = vmatpush1.bf16.msra.mxu0 %v267_v23  ;;  %s246_s2 = sshll.u32 %s337_s1, 4  ;;  %s247_s2 = int_to_ptr.vmem [resolvable:$true] %s246_s2 }
  0x1d   :  { %276 = vmatpush1.bf16.msra.mxu1 %v275_v25  ;;  %255 = vmatprep.subr.msk.mxu0 %vm54_vm0, %v47_v26  ;;  %s306_s29 = scalar_lea.vmem %s247_s2, 256  ;;  %p311_p9 = scmp.lt.s32.totalorder %s247_s2, %s247_s2 }
  0x1e   :  { %258 = vmatprep.subr.msk.mxu1 %vm54_vm0, %v49_v27  ;;  %p307_p8 = scmp.ne.s32.totalorder %s247_s2, %s306_s29  ;;  %p312_p10 = scmp.lt.s32.totalorder %s306_s29, %s306_s29 }
  0x20   :  { %256 = vmatpush1.msk.msra.mxu0 %vm54_vm0, %v46_v29  ;;  %p313_p11 = por %p312_p10, %p311_p9 }
  0x21   :  { %259 = vmatpush1.msk.msra.mxu1 %vm54_vm0, %v48_v30  ;;  %257 = vmatmul.mubr.msk.f32.vlgmr.msra.gmra.mrb[0].mxu0 %vm50_vm1, %v29_v31 }
  0x22   :  { %260 = vmatmul.mubr.msk.f32.vlgmr.msra.gmra.mrb[0].mxu1 %vm50_vm1, %v29_v31  ;;  %p314_p12 = pnand %p313_p11, %p307_p8 }
  0x99   :  { %v217_v33 = vpop.permute.xlu0 %216 }
  0xf4   :  { %v133_v32 = vpop.f32.mrb[0].mxu0 }
  0xf5   :  { %v209_v34 = vadd.f32 %v133_v32, %v133_v32  ;;  %v204_v35 = vpop.f32.mrb[0].mxu1  ;;  %v135_v36 = vpop.f32.mrb[1].mxu0 }
  0xf6   :  { %v211_v37 = vadd.f32 %v204_v35, %v204_v35  ;;  %v210_v38 = vadd.f32 %v135_v36, %v135_v36  ;;  %v206_v39 = vpop.f32.mrb[1].mxu1 }
  0xf7   :  { %v212_v40 = vadd.f32 %v206_v39, %v206_v39  ;;  %v219_v41 = vadd.f32 %v217_v33, %v209_v34 }
  0xf8   :  { %v220_v42 = vadd.f32 %v217_v33, %v210_v38  ;;  %v221_v43 = vadd.f32 %v217_v33, %v211_v37 }
  0xf9   :  { %v222_v44 = vadd.f32 %v217_v33, %v212_v40  ;;  %v223_v45 = vmax.f32 %v219_v41, 0.0 }
  0xfa   :  { %v224_v46 = vmax.f32 %v220_v42, 0.0  ;;  %v225_v47 = vmax.f32 %v221_v43, 0.0 }
  0xfb   :  { %v226_v48 = vmax.f32 %v222_v44, 0.0 }
  0xfc   :  { %v231_v49 = vcombine.low %v223_v45, %v224_v46 }
  0xfd   :  { %v232_v50 = vcombine.low %v225_v47, %v226_v48 }
  0xfe   :  { %235 = vst [vmem:[#allocation5] sm:$0x77] %v231_v49 }
  0xff   :  { %239 = vst.msk [vmem:[#allocation5 + $0x8] sm:$0x77] %vm238_vm4, %v232_v50 }
 0x100   :  { %317 = shalt.err (!%p314_p12)
}
 0x101   :  { %s318_s5 = scalar_lea.hbm %s391_s3, 256 }
 0x102   :  { %p319_p13 = scmp.ne.s32.totalorder %s391_s3, %s318_s5  ;;  %p322_p0 = scmp.lt.u32.totalorder %s318_s5, %s391_s3 }
 0x104   :  { %p324_p1 = pnand %p322_p0, %p319_p13 }
 0x106   :  { %327 = shalt.err (!%p324_p1)
}
 0x107   :  { %249 = dma.vmem_to_hbm [thread:$0]  %s247_s2, 256, %s391_s3, [#allocation4]  }
 0x108   :  { %330 = dma.done.wait [#allocation4], 256  }
 0x109   :  { %331 = vsyncadd [#allocation4], 4294967040 }
 0x10a   :  { %253 = vsyncpa [#allocation3], 1 }
 0x10b   :  { %254 = vsyncpa [#allocation4], 1 }

</bundles_post_ra>
